<compile_context>
chip_gen: v7x
topology: tpu7x:2x2x1
jax: 0.10.0
libtpu: 0.0.40
codegen_flags: <defaults>
</compile_context>

<pallas_src>
import functools

import jax
import jax.numpy as jnp
from jax import lax
from jax.experimental import pallas as pl
from jax.experimental.pallas import tpu as pltpu


# --------------------------------------------------------------------------
# VMEM sizing helpers (generation-aware)
# --------------------------------------------------------------------------
def _vmem_capacity_bytes():
    """Physical VMEM per core; falls back to the smallest current part (v7x)."""
    try:
        cap = int(pltpu.get_tpu_info().vmem_capacity_bytes)
        if cap > 0:
            return cap
    except Exception:  # interpret mode / older runtimes
        pass
    return 64 << 20


def _stream_bytes(cl, cg, hw_cols, dt_l, dt_g):
    """VMEM residency per batch element (or per lane column when hw_cols == 1):
    inputs + outputs, double-buffered, plus f32 compute temporaries (pool upcast
    / rescale product) for sub-f32 dtypes."""
    il = jnp.dtype(dt_l).itemsize
    ig = jnp.dtype(dt_g).itemsize
    io = 2 * 2 * (cl * il + cg * ig) * hw_cols
    tmp = ((cl * 4 * hw_cols) if il < 4 else 0) + ((cg * 4 * hw_cols) if ig < 4 else 0)
    return io + tmp


def _pick_batch_tile(n, per_n_bytes, budget_bytes):
    """Largest divisor nb of n whose residency fits the budget, preferring an
    even grid with >= 2 pipelined steps per TensorCore (>= 4 total) so a
    2-TC chip (v7x) gets balanced, double-buffered work; fall back to >= 2
    total steps, then to any fitting tile.  Returns None if nothing fits."""
    fits = [nb for nb in range(1, n + 1)
            if n % nb == 0 and nb * per_n_bytes <= budget_bytes]
    if not fits:
        return None

    def pick(pred):
        cand = [nb for nb in fits if pred(n // nb)]
        return max(cand) if cand else None

    nb = pick(lambda g: g >= 4 and g % 2 == 0)
    if nb is None and n >= 2:
        nb = pick(lambda g: g >= 2)
    if nb is None:
        nb = max(fits)
    return nb


# --------------------------------------------------------------------------
# Fast path: single fused kernel (pool + SE gate + rescale)
# --------------------------------------------------------------------------
def _ffcse_fused_kernel(xl_ref, xg_ref, w1_ref, b1_ref, w2t_ref, b2_ref,
                        ol_ref, og_ref, *, inv_hw, cl, mul_in_f32):
    """One batch tile.
       xl: (nb, Cl, HW), xg: (nb, Cg, HW)
       w1: (hid, C), b1: (1, hid), w2t: (hid, C), b2: (1, C)  (all f32)."""
    xl = xl_ref[...]
    xg = xg_ref[...]

    # Global average pool (AdaptiveAvgPool2d((1,1))).  The last dim is the true
    # HW (no padding), so a plain lane reduce + divide is exact.
    # NOTE: if bundle profiling on very wide HW shows the XLU as the binding
    # slot, replace this with chunked VPU accumulation over 128-lane slices.
    yl = jnp.sum(xl.astype(jnp.float32), axis=-1)                    # (nb, Cl)
    yg = jnp.sum(xg.astype(jnp.float32), axis=-1)                    # (nb, Cg)
    y = jnp.concatenate([yl, yg], axis=-1) * jnp.float32(inv_hw)     # (nb, C)

    w1 = w1_ref[...]          # (hid, C)
    b1 = b1_ref[...]          # (1, hid)
    w2t = w2t_ref[...]        # (hid, C)  pre-transposed: C stays lane-dense
    b2 = b2_ref[...]          # (1, C)

    # conv1 (1x1) + ReLU.  hid = channels // 16 is tiny, so keep the
    # contraction on the VPU/XLU instead of burning an MXU pass.
    h = jnp.maximum(
        jnp.sum(y[:, None, :] * w1[None, :, :], axis=-1) + b1, 0.0)  # (nb, hid)

    # conv_a2l / conv_a2g fused: contraction over hid (sublanes), C lane-dense
    # throughout, so no (nb, C, hid) nearly-empty vregs.
    gate = jax.nn.sigmoid(
        jnp.sum(h[:, :, None] * w2t[None, :, :], axis=1) + b2)       # (nb, C)

    gl = gate[:, :cl][:, :, None]                                    # (nb, Cl, 1)
    gg = gate[:, cl:][:, :, None]                                    # (nb, Cg, 1)

    if mul_in_f32:
        # Sub-f32 inputs: multiply in f32, cast once on the store (v5e has no
        # bf16 VALU anyway; on v6e/v7x the kernel is HBM-bound so the converts
        # ride in VALU slack).
        ol_ref[...] = (xl.astype(jnp.float32) * gl).astype(ol_ref.dtype)
        og_ref[...] = (xg.astype(jnp.float32) * gg).astype(og_ref.dtype)
    else:
        ol_ref[...] = (xl * gl.astype(xl.dtype)).astype(ol_ref.dtype)
        og_ref[...] = (xg * gg.astype(xg.dtype)).astype(og_ref.dtype)


def _ffcse_single_pass(xl, xg, w1, b1r, w2t, b2r, *, cl, nb, cap, donate_inputs):
    N, Cl, HW = xl.shape
    Cg = xg.shape[1]
    C = Cl + Cg
    hid = w1.shape[0]

    per_n = _stream_bytes(Cl, Cg, HW, xl.dtype, xg.dtype)
    param_bytes = 4 * (w1.size + b1r.size + w2t.size + b2r.size)
    resid = nb * per_n + 2 * param_bytes
    vmem_limit = int(min(max(resid + (4 << 20), 32 << 20), (cap * 9) // 10))

    mul_in_f32 = (jnp.dtype(xl.dtype) != jnp.float32
                  or jnp.dtype(xg.dtype) != jnp.float32)
    kernel = functools.partial(_ffcse_fused_kernel, inv_hw=1.0 / HW, cl=cl,
                               mul_in_f32=mul_in_f32)

    kwargs = {}
    if donate_inputs:
        kwargs["input_output_aliases"] = {0: 0, 1: 1}

    return pl.pallas_call(
        kernel,
        out_shape=(jax.ShapeDtypeStruct((N, Cl, HW), xl.dtype),
                   jax.ShapeDtypeStruct((N, Cg, HW), xg.dtype)),
        grid_spec=pltpu.PrefetchScalarGridSpec(
            num_scalar_prefetch=0,
            grid=(N // nb,),
            in_specs=[
                pl.BlockSpec((nb, Cl, HW), lambda n: (n, 0, 0)),   # x_l
                pl.BlockSpec((nb, Cg, HW), lambda n: (n, 0, 0)),   # x_g
                pl.BlockSpec((hid, C), lambda n: (0, 0)),          # conv1 W
                pl.BlockSpec((1, hid), lambda n: (0, 0)),          # conv1 b
                pl.BlockSpec((hid, C), lambda n: (0, 0)),          # conv_a2* W^T
                pl.BlockSpec((1, C), lambda n: (0, 0)),            # conv_a2* b
            ],
            out_specs=[
                pl.BlockSpec((nb, Cl, HW), lambda n: (n, 0, 0)),
                pl.BlockSpec((nb, Cg, HW), lambda n: (n, 0, 0)),
            ],
        ),
        compiler_params=pltpu.CompilerParams(
            dimension_semantics=("parallel",),
            vmem_limit_bytes=vmem_limit,
        ),
        **kwargs,
    )(xl, xg, w1, b1r, w2t, b2r)


# --------------------------------------------------------------------------
# Fallback path: two streaming passes over HW tiles
# --------------------------------------------------------------------------
def _pool_kernel(xl_ref, xg_ref, sum_ref, *, hw, thw, need_mask):
    t = pl.program_id(1)
    xl = xl_ref[...].astype(jnp.float32)             # (1, Cl, thw)
    xg = xg_ref[...].astype(jnp.float32)             # (1, Cg, thw)
    if need_mask:
        # Edge block: lanes beyond the true HW hold unspecified data.
        idx = lax.broadcasted_iota(jnp.int32, (1, 1, thw), 2) + t * thw
        valid = idx < hw
        xl = jnp.where(valid, xl, 0.0)
        xg = jnp.where(valid, xg, 0.0)
    part = jnp.concatenate(
        [jnp.sum(xl, axis=-1), jnp.sum(xg, axis=-1)], axis=-1)       # (1, C)

    @pl.when(t == 0)
    def _():
        sum_ref[...] = jnp.zeros_like(sum_ref)

    sum_ref[...] += part[:, None, :]


def _rescale_kernel(xl_ref, xg_ref, gl_ref, gg_ref, ol_ref, og_ref, *, mul_in_f32):
    gl = gl_ref[...]                                  # (1, Cl, 1) f32
    gg = gg_ref[...]                                  # (1, Cg, 1) f32
    if mul_in_f32:
        ol_ref[...] = (xl_ref[...].astype(jnp.float32) * gl).astype(ol_ref.dtype)
        og_ref[...] = (xg_ref[...].astype(jnp.float32) * gg).astype(og_ref.dtype)
    else:
        ol_ref[...] = (xl_ref[...] * gl.astype(ol_ref.dtype)).astype(ol_ref.dtype)
        og_ref[...] = (xg_ref[...] * gg.astype(og_ref.dtype)).astype(og_ref.dtype)


def _ffcse_two_pass(xl, xg, w1, b1r, w2t, b2r, *, cl, cap, budget, donate_inputs):
    N, Cl, HW = xl.shape
    Cg = xg.shape[1]
    C = Cl + Cg

    # Spatial tile (multiple of 128, or the full extent when HW <= 128).
    per_col = _stream_bytes(Cl, Cg, 1, xl.dtype, xg.dtype)
    if HW <= 128:
        thw = HW
    else:
        thw = max(128, (int(budget // max(per_col, 1)) // 128) * 128)
        thw = min(thw, ((HW + 127) // 128) * 128)
    gridt = pl.cdiv(HW, thw)
    need_mask = (HW % thw) != 0

    est = _stream_bytes(Cl, Cg, thw, xl.dtype, xg.dtype) + 8 * C * 4
    vmem_limit = int(min(max(est + (4 << 20), 32 << 20), (cap * 9) // 10))

    mul_in_f32 = (jnp.dtype(xl.dtype) != jnp.float32
                  or jnp.dtype(xg.dtype) != jnp.float32)

    # ---- pass 1: pool over HW tiles into a per-image channel-sum accumulator
    pooled = pl.pallas_call(
        functools.partial(_pool_kernel, hw=HW, thw=thw, need_mask=need_mask),
        out_shape=jax.ShapeDtypeStruct((N, 1, C), jnp.float32),
        grid_spec=pltpu.PrefetchScalarGridSpec(
            num_scalar_prefetch=0,
            grid=(N, gridt),
            in_specs=[
                pl.BlockSpec((1, Cl, thw), lambda n, t: (n, 0, t)),
                pl.BlockSpec((1, Cg, thw), lambda n, t: (n, 0, t)),
            ],
            out_specs=pl.BlockSpec((1, 1, C), lambda n, t: (n, 0, 0)),
        ),
        compiler_params=pltpu.CompilerParams(
            dimension_semantics=("parallel", "arbitrary"),
            vmem_limit_bytes=vmem_limit,
        ),
    )(xl, xg)

    # ---- gate math is tiny ((N, C)); plain JAX between the passes ----
    y = pooled[:, 0, :] * jnp.float32(1.0 / HW)
    h = jax.nn.relu(y @ w1.T + b1r)                  # (N, hid)
    gate = jax.nn.sigmoid(h @ w2t + b2r)             # (N, C)
    gl = gate[:, :cl].reshape(N, Cl, 1).astype(jnp.float32)
    gg = gate[:, cl:].reshape(N, Cg, 1).astype(jnp.float32)

    # ---- pass 2: stream x again and rescale with the precomputed gate ----
    kwargs = {}
    if donate_inputs:
        kwargs["input_output_aliases"] = {0: 0, 1: 1}
    out_l, out_g = pl.pallas_call(
        functools.partial(_rescale_kernel, mul_in_f32=mul_in_f32),
        out_shape=(jax.ShapeDtypeStruct((N, Cl, HW), xl.dtype),
                   jax.ShapeDtypeStruct((N, Cg, HW), xg.dtype)),
        grid_spec=pltpu.PrefetchScalarGridSpec(
            num_scalar_prefetch=0,
            grid=(N, gridt),
            in_specs=[
                pl.BlockSpec((1, Cl, thw), lambda n, t: (n, 0, t)),
                pl.BlockSpec((1, Cg, thw), lambda n, t: (n, 0, t)),
                pl.BlockSpec((1, Cl, 1), lambda n, t: (n, 0, 0)),
                pl.BlockSpec((1, Cg, 1), lambda n, t: (n, 0, 0)),
            ],
            out_specs=[
                pl.BlockSpec((1, Cl, thw), lambda n, t: (n, 0, t)),
                pl.BlockSpec((1, Cg, thw), lambda n, t: (n, 0, t)),
            ],
        ),
        compiler_params=pltpu.CompilerParams(
            dimension_semantics=("parallel", "parallel"),
            vmem_limit_bytes=vmem_limit,
        ),
        **kwargs,
    )(xl, xg, gl, gg)
    return out_l, out_g


# --------------------------------------------------------------------------
# Public wrapper
# --------------------------------------------------------------------------
def ffcse_block(x_l, x_g, params, *, vmem_budget_bytes=None, donate_inputs=False):
    """x_l: (N, Cl, H, W), x_g: (N, Cg, H, W) -> (out_l, out_g), same shapes."""
    w1l, w1g, b1, w2l, b2l, w2g, b2g = params
    N, Cl, H, W = x_l.shape
    Cg = x_g.shape[1]
    C = Cl + Cg
    hid = w1l.shape[0]
    HW = H * W

    # TODO(synk): degenerate configs (in_cl == 0 or in_cg == 0, where the PyTorch
    # module returns the python scalar 0 for the missing branch) are not handled;
    # both branches must exist.

    cap = _vmem_capacity_bytes()
    if vmem_budget_bytes is None:
        # Generation-aware: ~75% of physical VMEM (v5e/v6e 128 MiB, v7x 64 MiB),
        # leaving headroom for compiler scratch.
        vmem_budget_bytes = (cap * 3) // 4

    # Consolidate SE parameters: one weight/bias pair per 1x1-conv stage.
    f32 = jnp.float32
    w1 = jnp.concatenate([w1l, w1g], axis=1).astype(f32)             # (hid, C)
    b1r = b1.reshape(1, hid).astype(f32)                             # (1, hid)
    # conv_a2l / conv_a2g fused and pre-transposed so C stays lane-dense.
    w2t = jnp.concatenate([w2l, w2g], axis=0).T.astype(f32)          # (hid, C)
    b2r = jnp.concatenate([b2l, b2g], axis=0).reshape(1, C).astype(f32)

    xl = x_l.reshape(N, Cl, HW)
    xg = x_g.reshape(N, Cg, HW)

    param_bytes = 4 * (w1.size + b1r.size + w2t.size + b2r.size)
    per_n = _stream_bytes(Cl, Cg, HW, xl.dtype, xg.dtype)
    nb = _pick_batch_tile(N, per_n, max(vmem_budget_bytes - 2 * param_bytes, 0))

    if nb is not None:
        out_l, out_g = _ffcse_single_pass(xl, xg, w1, b1r, w2t, b2r,
                                          cl=Cl, nb=nb, cap=cap,
                                          donate_inputs=donate_inputs)
    else:
        out_l, out_g = _ffcse_two_pass(xl, xg, w1, b1r, w2t, b2r,
                                       cl=Cl, cap=cap, budget=vmem_budget_bytes,
                                       donate_inputs=donate_inputs)

    return out_l.reshape(N, Cl, H, W), out_g.reshape(N, Cg, H, W)


def ffcse_reference(x_l, x_g, params):
    """Pure-JAX reference matching the PyTorch forward pass."""
    w1l, w1g, b1, w2l, b2l, w2g, b2g = params
    x = jnp.concatenate([x_l, x_g], axis=1)
    y = jnp.mean(x, axis=(2, 3))                           # (N, C)
    w1 = jnp.concatenate([w1l, w1g], axis=1)               # (hid, C)
    h = jax.nn.relu(y @ w1.T + b1[:, 0])                   # (N, hid)
    al = jax.nn.sigmoid(h @ w2l.T + b2l[:, 0])             # (N, Cl)
    ag = jax.nn.sigmoid(h @ w2g.T + b2g[:, 0])             # (N, Cg)
    return x_l * al[:, :, None, None], x_g * ag[:, :, None, None]


if __name__ == "__main__":
    # Module config: channels=32, ratio_g=0.5 -> in_cl=16, in_cg=16, hid=2
    channels = 32
    ratio_g = 0.5
    in_cg = int(channels * ratio_g)
    in_cl = channels - in_cg
    hid = channels // 16

    key = jax.random.PRNGKey(0)
    ks = jax.random.split(key, 8)

    w1 = 0.2 * jax.random.normal(ks[0], (hid, channels), jnp.float32)
    b1 = 0.1 * jax.random.normal(ks[1], (hid, 1), jnp.float32)
    w2l = 0.2 * jax.random.normal(ks[2], (in_cl, hid), jnp.float32)
    b2l = 0.1 * jax.random.normal(ks[3], (in_cl, 1), jnp.float32)
    w2g = 0.2 * jax.random.normal(ks[4], (in_cg, hid), jnp.float32)
    b2g = 0.1 * jax.random.normal(ks[5], (in_cg, 1), jnp.float32)
    params = (w1[:, :in_cl], w1[:, in_cl:], b1, w2l, b2l, w2g, b2g)

    # 1) lane-aligned spatial (HW = 256): single fused pass.
    N, H, W = 2, 16, 16
    x_l = jax.random.normal(ks[6], (N, in_cl, H, W), jnp.float32)
    x_g = jax.random.normal(ks[7], (N, in_cg, H, W), jnp.float32)
    out_l, out_g = ffcse_block(x_l, x_g, params)
    jax.block_until_ready((out_l, out_g))
    ref_l, ref_g = ffcse_reference(x_l, x_g, params)
    assert jnp.allclose(out_l, ref_l, atol=1e-5, rtol=1e-5)
    assert jnp.allclose(out_g, ref_g, atol=1e-5, rtol=1e-5)

    # 2) ragged spatial (HW = 225): no host-side pad/slice, kernel takes the
    #    full-extent last dim and accepts the masked tail store.
    H2 = W2 = 15
    x_l2 = jax.random.normal(ks[6], (N, in_cl, H2, W2), jnp.float32)
    x_g2 = jax.random.normal(ks[7], (N, in_cg, H2, W2), jnp.float32)
    out_l2, out_g2 = ffcse_block(x_l2, x_g2, params)
    jax.block_until_ready((out_l2, out_g2))
    ref_l2, ref_g2 = ffcse_reference(x_l2, x_g2, params)
    assert jnp.allclose(out_l2, ref_l2, atol=1e-5, rtol=1e-5)
    assert jnp.allclose(out_g2, ref_g2, atol=1e-5, rtol=1e-5)

    # 3) force the two-pass streaming fallback (tiny budget) on the ragged shape
    #    to exercise the masked pooling + edge-block rescale path.
    out_l3, out_g3 = ffcse_block(x_l2, x_g2, params, vmem_budget_bytes=64 << 10)
    jax.block_until_ready((out_l3, out_g3))
    assert jnp.allclose(out_l3, ref_l2, atol=1e-5, rtol=1e-5)
    assert jnp.allclose(out_g3, ref_g2, atol=1e-5, rtol=1e-5)

    print("KERNEL_OK")
</pallas_src>

<mosaic_0001>
module attributes {stable_mosaic.version = 11 : i64} {
  func.func @_ffcse_fused_kernel(%arg0: i32, %arg1: memref<1x16x256xf32, #tpu.memory_space<vmem>>, %arg2: memref<1x16x256xf32, #tpu.memory_space<vmem>>, %arg3: memref<2x32xf32, #tpu.memory_space<vmem>>, %arg4: memref<1x2xf32, #tpu.memory_space<vmem>>, %arg5: memref<2x32xf32, #tpu.memory_space<vmem>>, %arg6: memref<1x32xf32, #tpu.memory_space<vmem>>, %arg7: memref<1x16x256xf32, #tpu.memory_space<vmem>>, %arg8: memref<1x16x256xf32, #tpu.memory_space<vmem>>) attributes {dimension_semantics = [#tpu.dimension_semantics<parallel>], iteration_bounds = array<i64: 2>, scalar_prefetch = 0 : i64, scratch_operands = 0 : i64, tpu.core_type = #tpu.core_type<tc>, window_params = [{transform_indices = @transform_0, window_bounds = array<i64: 1, 16, 256>}, {transform_indices = @transform_1, window_bounds = array<i64: 1, 16, 256>}, {pipeline_mode = #tpu.pipeline_mode<synchronous>, transform_indices = @transform_2, window_bounds = array<i64: 2, 32>}, {pipeline_mode = #tpu.pipeline_mode<synchronous>, transform_indices = @transform_3, window_bounds = array<i64: 1, 2>}, {pipeline_mode = #tpu.pipeline_mode<synchronous>, transform_indices = @transform_4, window_bounds = array<i64: 2, 32>}, {pipeline_mode = #tpu.pipeline_mode<synchronous>, transform_indices = @transform_5, window_bounds = array<i64: 1, 32>}, {transform_indices = @transform_6, window_bounds = array<i64: 1, 16, 256>}, {transform_indices = @transform_7, window_bounds = array<i64: 1, 16, 256>}]} {
    %c0 = arith.constant 0 : index
    %c0_0 = arith.constant 0 : index
    %c0_1 = arith.constant 0 : index
    %0 = vector.load %arg1[%c0, %c0_0, %c0_1] : memref<1x16x256xf32, #tpu.memory_space<vmem>>, vector<1x16x256xf32>
    %c0_2 = arith.constant 0 : index
    %c0_3 = arith.constant 0 : index
    %c0_4 = arith.constant 0 : index
    %1 = vector.load %arg2[%c0_2, %c0_3, %c0_4] : memref<1x16x256xf32, #tpu.memory_space<vmem>>, vector<1x16x256xf32>
    %cst = arith.constant dense<0.000000e+00> : vector<1x16xf32>
    %2 = vector.multi_reduction <add>, %0, %cst [2] : vector<1x16x256xf32> to vector<1x16xf32>
    %cst_5 = arith.constant dense<0.000000e+00> : vector<1x16xf32>
    %3 = vector.multi_reduction <add>, %1, %cst_5 [2] : vector<1x16x256xf32> to vector<1x16xf32>
    %4 = tpu.concatenate %2, %3 in 1 : vector<1x16xf32>, vector<1x16xf32> -> vector<1x32xf32>
    %cst_6 = arith.constant 3.906250e-03 : f32
    %5 = vector.broadcast %cst_6 : f32 to vector<1x32xf32>
    %6 = arith.mulf %4, %5 : vector<1x32xf32>
    %c0_7 = arith.constant 0 : index
    %c0_8 = arith.constant 0 : index
    %7 = vector.load %arg3[%c0_7, %c0_8] : memref<2x32xf32, #tpu.memory_space<vmem>>, vector<2x32xf32>
    %c0_9 = arith.constant 0 : index
    %c0_10 = arith.constant 0 : index
    %8 = vector.load %arg4[%c0_9, %c0_10] : memref<1x2xf32, #tpu.memory_space<vmem>>, vector<1x2xf32>
    %c0_11 = arith.constant 0 : index
    %c0_12 = arith.constant 0 : index
    %9 = vector.load %arg5[%c0_11, %c0_12] : memref<2x32xf32, #tpu.memory_space<vmem>>, vector<2x32xf32>
    %c0_13 = arith.constant 0 : index
    %c0_14 = arith.constant 0 : index
    %10 = vector.load %arg6[%c0_13, %c0_14] : memref<1x32xf32, #tpu.memory_space<vmem>>, vector<1x32xf32>
    %11 = vector.shape_cast %6 : vector<1x32xf32> to vector<1x1x32xf32>
    %12 = vector.shape_cast %7 : vector<2x32xf32> to vector<1x2x32xf32>
    %13 = vector.broadcast %11 : vector<1x1x32xf32> to vector<1x2x32xf32>
    %14 = arith.mulf %13, %12 : vector<1x2x32xf32>
    %cst_15 = arith.constant dense<0.000000e+00> : vector<1x2xf32>
    %15 = vector.multi_reduction <add>, %14, %cst_15 [2] : vector<1x2x32xf32> to vector<1x2xf32>
    %16 = arith.addf %15, %8 : vector<1x2xf32>
    %cst_16 = arith.constant 0.000000e+00 : f32
    %17 = vector.broadcast %cst_16 : f32 to vector<1x2xf32>
    %18 = arith.maximumf %16, %17 : vector<1x2xf32>
    %19 = vector.shape_cast %18 : vector<1x2xf32> to vector<1x2x1xf32>
    %20 = vector.shape_cast %9 : vector<2x32xf32> to vector<1x2x32xf32>
    %21 = vector.broadcast %19 : vector<1x2x1xf32> to vector<1x2x32xf32>
    %22 = arith.mulf %21, %20 : vector<1x2x32xf32>
    %cst_17 = arith.constant dense<0.000000e+00> : vector<1x32xf32>
    %23 = vector.multi_reduction <add>, %22, %cst_17 [1] : vector<1x2x32xf32> to vector<1x32xf32>
    %24 = arith.addf %23, %10 : vector<1x32xf32>
    %25 = arith.negf %24 : vector<1x32xf32>
    %26 = math.exp %25 : vector<1x32xf32>
    %cst_18 = arith.constant 1.000000e+00 : f32
    %27 = vector.broadcast %cst_18 : f32 to vector<1x32xf32>
    %28 = arith.addf %27, %26 : vector<1x32xf32>
    %29 = arith.divf %27, %28 : vector<1x32xf32>
    %30 = vector.extract_strided_slice %29 {offsets = [0, 0], sizes = [1, 16], strides = [1, 1]} : vector<1x32xf32> to vector<1x16xf32>
    %31 = vector.shape_cast %30 : vector<1x16xf32> to vector<1x16x1xf32>
    %32 = vector.extract_strided_slice %29 {offsets = [0, 16], sizes = [1, 16], strides = [1, 1]} : vector<1x32xf32> to vector<1x16xf32>
    %33 = vector.shape_cast %32 : vector<1x16xf32> to vector<1x16x1xf32>
    %34 = vector.broadcast %31 : vector<1x16x1xf32> to vector<1x16x256xf32>
    %35 = arith.mulf %0, %34 : vector<1x16x256xf32>
    %c0_19 = arith.constant 0 : index
    %c0_20 = arith.constant 0 : index
    %c0_21 = arith.constant 0 : index
    %36 = vector.load %arg7[%c0_19, %c0_20, %c0_21] : memref<1x16x256xf32, #tpu.memory_space<vmem>>, vector<1x16x256xf32>
    tpu.vector_store %arg7[%c0_19, %c0_20, %c0_21], %35 {strides = array<i32>} : memref<1x16x256xf32, #tpu.memory_space<vmem>>, vector<1x16x256xf32>,
    %37 = vector.broadcast %33 : vector<1x16x1xf32> to vector<1x16x256xf32>
    %38 = arith.mulf %1, %37 : vector<1x16x256xf32>
    %c0_22 = arith.constant 0 : index
    %c0_23 = arith.constant 0 : index
    %c0_24 = arith.constant 0 : index
    %39 = vector.load %arg8[%c0_22, %c0_23, %c0_24] : memref<1x16x256xf32, #tpu.memory_space<vmem>>, vector<1x16x256xf32>
    tpu.vector_store %arg8[%c0_22, %c0_23, %c0_24], %38 {strides = array<i32>} : memref<1x16x256xf32, #tpu.memory_space<vmem>>, vector<1x16x256xf32>,
    return
  }
  func.func @transform_0(%arg0: i32) -> (i32, i32, i32) {
    %c0_i32 = arith.constant 0 : i32
    %c0_i32_0 = arith.constant 0 : i32
    %c0_i32_1 = arith.constant 0 : i32
    return %arg0, %c0_i32, %c0_i32_0 : i32, i32, i32
  }
  func.func @transform_1(%arg0: i32) -> (i32, i32, i32) {
    %c0_i32 = arith.constant 0 : i32
    %c0_i32_0 = arith.constant 0 : i32
    %c0_i32_1 = arith.constant 0 : i32
    return %arg0, %c0_i32, %c0_i32_0 : i32, i32, i32
  }
  func.func @transform_2(%arg0: i32) -> (i32, i32) {
    %c0_i32 = arith.constant 0 : i32
    %c0_i32_0 = arith.constant 0 : i32
    %c0_i32_1 = arith.constant 0 : i32
    return %c0_i32, %c0_i32_0 : i32, i32
  }
  func.func @transform_3(%arg0: i32) -> (i32, i32) {
    %c0_i32 = arith.constant 0 : i32
    %c0_i32_0 = arith.constant 0 : i32
    %c0_i32_1 = arith.constant 0 : i32
    return %c0_i32, %c0_i32_0 : i32, i32
  }
  func.func @transform_4(%arg0: i32) -> (i32, i32) {
    %c0_i32 = arith.constant 0 : i32
    %c0_i32_0 = arith.constant 0 : i32
    %c0_i32_1 = arith.constant 0 : i32
    return %c0_i32, %c0_i32_0 : i32, i32
  }
  func.func @transform_5(%arg0: i32) -> (i32, i32) {
    %c0_i32 = arith.constant 0 : i32
    %c0_i32_0 = arith.constant 0 : i32
    %c0_i32_1 = arith.constant 0 : i32
    return %c0_i32, %c0_i32_0 : i32, i32
  }
  func.func @transform_6(%arg0: i32) -> (i32, i32, i32) {
    %c0_i32 = arith.constant 0 : i32
    %c0_i32_0 = arith.constant 0 : i32
    %c0_i32_1 = arith.constant 0 : i32
    return %arg0, %c0_i32, %c0_i32_0 : i32, i32, i32
  }
  func.func @transform_7(%arg0: i32) -> (i32, i32, i32) {
    %c0_i32 = arith.constant 0 : i32
    %c0_i32_0 = arith.constant 0 : i32
    %c0_i32_1 = arith.constant 0 : i32
    return %arg0, %c0_i32, %c0_i32_0 : i32, i32, i32
  }
}

</mosaic_0001>

<bundles_post_ra>
// kernel: tpu_custom_call.1
= control target key start
LH: loop header
LB: loop body
LE: loop exit
PB: predicated region body
PF: predicated region fallthrough
CT: control target
= control target key end

     0   :  { %s1265_s0 = inlined_call_operand.hbm [shape: f32[2,16,256], index: 0, kind: input, shape index: {}]   ;;  %s1266_s1 = inlined_call_operand.hbm [shape: f32[2,16,256], index: 1, kind: input, shape index: {}]   ;;  %s1267_s2 = inlined_call_operand.vmem [shape: f32[2,32], index: 2, kind: input, shape index: {}]   ;;  %s1268_s3 = inlined_call_operand.vmem [shape: f32[1,2], index: 3, kind: input, shape index: {}]   ;;  %s1269_s4 = inlined_call_operand.vmem [shape: f32[2,32], index: 4, kind: input, shape index: {}]   ;;  %s1270_s5 = inlined_call_operand.vmem [shape: f32[1,32], index: 5, kind: input, shape index: {}]   ;;  %s1271_s6 = inlined_call_operand.hbm [shape: f32[2,16,256], index: 6, kind: output, shape index: {0}]   ;;  %s1272_s7 = inlined_call_operand.hbm [shape: f32[2,16,256], index: 7, kind: output, shape index: {1}]  }
   0x1   :  { %1277 = sst [smem:[#allocation15_spill]] %s1265_s0 }
   0x2   :  { %13 = vsyncpa [#allocation3], 0 }
   0x3   :  { %15 = vsyncpa [#allocation3 + $0x1], 0 }
   0x4   :  { %16 = vsyncpa [#allocation6], 0 }
   0x5   :  { %18 = vsyncpa [#allocation6 + $0x1], 0 }
   0x6   :  { %19 = vsyncpa [#allocation4], 0 }
   0x7   :  { %21 = vsyncpa [#allocation4 + $0x1], 0 }
   0x8   :  { %22 = vsyncpa [#allocation9], 0 }
   0x9   :  { %24 = vsyncpa [#allocation9 + $0x1], 0  ;;  %s951_s24 = smov 0   ;;  %s953_s25 = smov 0  }
   0xa   :  { %s955_s26 = smov 0   ;;  %s957_s27 = smov 0  }
   0xb LB: > { %s972_s28 = sadd.s32 4294967295, %s900_s27   ;;  %s644_s29 = sadd.s32 4294967294, %s900_s27   ;;  %s900_s27 = sphi %s957_s27, %s1296_s27   ;;  %s896_s26 = sphi %s955_s26, %s1295_s26   ;;  %s892_s25 = sphi %s953_s25, %s1294_s25   ;;  %s888_s24 = sphi %s951_s24, %s1293_s24  }
   0xc   : > { %s976_s30 = sadd.s32 1, %s900_s27   ;;  %s37_s8 = sadd.s32 1, %s896_s26 }
   0xd   : > { %s34_s9 = ssub.s32 %s900_s27, %s976_s30  ;;  %p44_p0 = scmp.ne.s32.totalorder %s896_s26, %s892_s25 }
   0xe   : > { %p35_p1 = scmp.eq.s32.totalorder %s34_s9, 0  ;;  %p45_p2 = scmp.eq.s32.totalorder %s900_s27, 0 }
   0xf   : > { %p50_p3 = scmp.ne.s32.totalorder %s892_s25, %s888_s24  ;;  %p51_p4 = scmp.eq.s32.totalorder %s972_s28, 0 }
  0x10   : > { %s988_s10 = scalar_select %p35_p1, %s896_s26, %s37_s8  }
  0x11   : > { %p990_p5 = por %p45_p2, %p44_p0  ;;  %p994_p6 = por %p51_p4, %p50_p3 }
  0x12   : > { %1278 = sst [smem:[#allocation14_spill]] %s988_s10  ;;  %p184_p7 = scmp.eq.s32.totalorder %s972_s28, 1 }
  0x13   : > { %s1280_s12 = scalar_select %p994_p6, 1, 0 }
  0x14   : > { %p190_p8 = scmp.eq.s32.totalorder %s644_s29, 1  ;;  %p694_p10 = scmp.lt.s32.totalorder %s900_s27, 2 }
  0x15   : > { %p1001_p11 = por %p184_p7, %p44_p0  ;;  %s1010_s15 = sand.u32 1, %s896_s26  }
  0x16   : > { %p1005_p12 = por %p190_p8, %p50_p3  ;;  %s668_s16 = sshll.u32 %s900_s27, 9 }
  0x17   : > { %s1281_s13 = scalar_select %p1001_p11, 1, 0 }
  0x18   : > { %s1282_s14 = scalar_select %p1005_p12, 1, 0 }
  0x19   : > { %s1273_s17 = sshll.u32 %s1010_s15, 5  ;;  %s1283_s0 = sld [smem:[#allocation15_spill]] }
  0x1a   : > { %s252_s21 = scalar_lea.vmem [#allocation2], %s1273_s17  ;;  %p1025_p13 = pnand %p694_p10, %p990_p5 }
  0x1b   : > { %s259_s22 = sshll.u32 %s252_s21, 4  ;;  %s249_s29 = scalar_lea.sflag [#allocation3], %s1010_s15  ;;  %s1029_s22 = int_to_ptr.vmem [resolvable:$true] %s259_s22 }
  0x1c   : > { %p740_p1 = pneg %p1025_p13 }
  0x1f   : > { %s1019_s20 = scalar_lea.hbm %s1283_s0, %s668_s16  ;;  %s743_s11 = scalar_lea.hbm %s1283_s0, 1024 }
  0x20   : > { %s738_s8 = scalar_lea.hbm %s1019_s20, 512  ;;  %p744_p4 = scmp.lt.u32.totalorder %s1019_s20, %s1283_s0 }
  0x21   : > { %p739_p0 = scmp.ne.s32.totalorder %s1019_s20, %s738_s8  ;;  %p745_p5 = scmp.lt.u32.totalorder %s743_s11, %s738_s8 }
  0x22   : > { %p747_p8 = scmp.lt.u32.totalorder %s738_s8, %s1019_s20 }
  0x23   : > { %p741_p2 = pnand %p740_p1, %p739_p0  ;;  %p746_p7 = por %p745_p5, %p744_p4 }
  0x25   : > { %p742_p3 = pneg %p741_p2  ;;  %p748_p10 = por %p747_p8, %p746_p7 }
  0x27   : > { %p749_p9 = pnand %p748_p10, %p742_p3 }
  0x29   : > { %752 = shalt.err (!%p749_p9)
}
  0x2a   : > { %s753_s17 = scalar_lea.vmem %s1029_s22, 512  ;;  %s902_s9 = smov [#allocation2]  }
  0x2b   : > { %p754_p0 = scmp.ne.s32.totalorder %s1029_s22, %s753_s17  ;;  %s758_s18 = sshll.u32 %s902_s9, 4  ;;  %s759_s18 = int_to_ptr.vmem [resolvable:$false] %s758_s18 }
  0x2c   : > { %s760_s19 = scalar_lea.vmem %s759_s18, 1024  ;;  %p761_p11 = scmp.lt.s32.totalorder %s1029_s22, %s759_s18 }
  0x2d   : > { %p756_p2 = pnand %p754_p0, %p740_p1  ;;  %p762_p4 = scmp.lt.s32.totalorder %s760_s19, %s753_s17 }
  0x2f   : > { %p757_p12 = pneg %p756_p2  ;;  %p763_p5 = por %p762_p4, %p761_p11 }
  0x31   : > { %p764_p7 = pnand %p763_p5, %p757_p12 }
  0x33   : > { %767 = shalt.err (!%p764_p7)
}
  0x34   : > { %s1275_s8 = smov 256   ;;  %s904_s11 = smov 16  }
  0x35   : > { %683 = dma.hbm_to_vmem [thread:$0]  (!%p1025_p13), %s1019_s20, 512, %s1029_s22, %s249_s29, %s1275_s8, %s1275_s8, %s904_s11  }
  0x36   : > { %p653_p9 = scmp.ge.s32.totalorder %s900_s27, 1  ;;  %p288_p11 = scmp.lt.s32.totalorder %s900_s27, 3 }
  0x37   : > { %s1073_s18 = scalar_lea.hbm %s1266_s1, %s668_s16  ;;  %s1286_s19 = sshll.u32 %s1010_s15, 5 }
  0x38   : > { %p1064_p12 = pnand %p653_p9, %p288_p11  ;;  %s273_s0 = scalar_lea.vmem [#allocation5], %s1286_s19 }
  0x39   : > { %s280_s10 = sshll.u32 %s273_s0, 4  ;;  %s270_s20 = scalar_lea.sflag [#allocation6], %s1010_s15  ;;  %s1077_s10 = int_to_ptr.vmem [resolvable:$true] %s280_s10 }
  0x3a   : > { %s768_s22 = scalar_lea.hbm %s1073_s18, 512  ;;  %s773_s16 = scalar_lea.hbm %s1266_s1, 1024 }
  0x3b   : > { %p769_p3 = scmp.ne.s32.totalorder %s1073_s18, %s768_s22  ;;  %p774_p0 = scmp.lt.u32.totalorder %s1073_s18, %s1266_s1 }
  0x3c   : > { %p775_p2 = scmp.lt.u32.totalorder %s773_s16, %s768_s22  ;;  %p777_p5 = scmp.lt.u32.totalorder %s768_s22, %s1073_s18 }
  0x3d   : > { %p771_p8 = pnand %p769_p3, %p740_p1 }
  0x3e   : > { %p776_p4 = por %p775_p2, %p774_p0 }
  0x3f   : > { %p772_p10 = pneg %p771_p8 }
  0x40   : > { %p778_p7 = por %p777_p5, %p776_p4 }
  0x42   : > { %p779_p9 = pnand %p778_p7, %p772_p10 }
  0x44   : > { %782 = shalt.err (!%p779_p9)
}
  0x45   : > { %s783_s0 = scalar_lea.vmem %s1077_s10, 512  ;;  %s905_s19 = smov [#allocation5]  }
  0x46   : > { %p784_p11 = scmp.ne.s32.totalorder %s1077_s10, %s783_s0  ;;  %s788_s29 = sshll.u32 %s905_s19, 4  ;;  %s789_s29 = int_to_ptr.vmem [resolvable:$false] %s788_s29 }
  0x47   : > { %s790_s8 = scalar_lea.vmem %s789_s29, 1024  ;;  %p791_p6 = scmp.lt.s32.totalorder %s1077_s10, %s789_s29 }
  0x48   : > { %p786_p3 = pnand %p784_p11, %p740_p1  ;;  %p792_p0 = scmp.lt.s32.totalorder %s790_s8, %s783_s0 }
  0x4a   : > { %p787_p8 = pneg %p786_p3  ;;  %p793_p2 = por %p792_p0, %p791_p6 }
  0x4c   : > { %p794_p4 = pnand %p793_p2, %p787_p8 }
  0x4e   : > { %797 = shalt.err (!%p794_p4)
}
  0x4f   : > { %s1287_s22 = smov 256   ;;  %292 = sbr.rel (%p1064_p12) target bundleno = 730 (0x2da), region = 44 }
  0x50   : > { %686 = dma.hbm_to_vmem [thread:$0]  (!%p1025_p13), %s1073_s18, 512, %s1077_s10, %s270_s20, %s1287_s22, %s1287_s22, %s904_s11  }
  0x51   : > { %s1111_s21 = sand.u32 (!%p1064_p12), 1, %s892_s25   ;;  %p1288_p6 = scmp.ne.s32.totalorder (!%p1064_p12), %s1280_s12, 0 }
  0x52   : > { %s1114_s16 = sshll.u32 (!%p1064_p12), %s1111_s21, 5  ;;  %s295_s23 = scalar_lea.sflag (!%p1064_p12), [#allocation3], %s1111_s21 }
  0x53   : > { %s298_s9 = scalar_lea.vmem (!%p1064_p12), [#allocation2], %s1114_s16 }
  0x56   : > { %871 = dma.done.wait (%p1288_p6), %s295_s23, 512  }
  0x57   : > { %873 = vsyncadd (%p1288_p6), %s295_s23, 4294966784  ;;  %s304_s10 = scalar_lea.sflag [#allocation6], %s1111_s21  ;;  %s307_s15 = scalar_lea.vmem [#allocation5], %s1114_s16 }
  0x58   : > { %875 = dma.done.wait (%p1288_p6), %s304_s10, 512  }
  0x59   : > { %877 = vsyncadd (%p1288_p6), %s304_s10, 4294966784  ;;  %v1128_v0 = vld [vmem:[%s307_s15] sm:$0xff]  ;;  %v1130_v1 = vld [vmem:[%s307_s15 + $0x8] sm:$0xff]  ;;  %v370_v13 = vlaneseq  ;;  %vm396_vm0 = vcmask 261312   ;;  %vm381_vm1 = vcmask 130112   ;;  %vm399_vm2 = vcmask 130048  }
  0x5a   : > { %v1132_v2 = vld [vmem:[%s298_s9] sm:$0xff]  ;;  %v362_v3 = vadd.f32 %v1130_v1, %v1128_v0  ;;  %v1136_v4 = vld [vmem:[%s298_s9 + $0x8] sm:$0xff]  ;;  %v1138_v5 = vld [vmem:[%s307_s15 + $0x10] sm:$0xff]  ;;  %vm411_vm3 = vcmask 254976   ;;  %v906_v40 = vmov 0   ;;  %s340_s8 = scalar_lea.vmem [#allocation7], %s1114_s16 }
  0x5b   : > { %v1140_v6 = vld [vmem:[%s307_s15 + $0x18] sm:$0xff]  ;;  %v356_v7 = vadd.f32 %v1136_v4, %v1132_v2  ;;  %v1144_v8 = vld [vmem:[%s298_s9 + $0x10] sm:$0xff]  ;;  %v658_v12 = vld [vmem:[%s1268_s3] ss:$0 sm:$0xff]  ;;  %v371_v14 = vand.u32 127, %v370_v13  ;;  %v373_v15 = vshrl.u32 %v370_v13, 7  ;;  %733 = vset.pattern.permute.xlu0 %v906_v40 }
  0x5c   : > { %v1146_v9 = vld [vmem:[%s298_s9 + $0x18] sm:$0xff]  ;;  %363 = vadd.xlane.f32.xlu1 %v362_v3  ;;  %v365_v10 = vadd.f32 %v1140_v6, %v1138_v5  ;;  %v402_v36 = vld [vmem:[%s1267_s2] sm:$0x3]  ;;  %s500_s22 = sshll.u32 %s340_s8, 4  ;;  %s670_s23 = sshll.u32 %s972_s28, 9  ;;  %s1168_s22 = int_to_ptr.vmem [resolvable:$true] %s500_s22 }
  0x5d   : > { %357 = vadd.xlane.f32.xlu0 %v356_v7  ;;  %v359_v11 = vadd.f32 %v1146_v9, %v1144_v8  ;;  %v386_v16 = vadd.s32 4294967280, %v371_v14  ;;  %v391_v17 = vadd.s32 4294967272, %v371_v14  ;;  %v376_v18 = vadd.s32 4294967288, %v371_v14  ;;  %v404_v45 = vld [vmem:[%s1269_s4] sm:$0x3]  ;;  %s1175_s15 = scalar_lea.hbm %s1271_s6, %s670_s23  ;;  %s482_s12 = scalar_lea.sflag [#allocation4], %s1111_s21 }
  0x5e   : > { %v374_v23 = vsub.s32 %v371_v14, %v373_v15  ;;  %v408_v33 = vsub.s32 0, %v373_v15  ;;  %v405_v54 = vld [vmem:[%s1270_s5] sm:$0x1]  ;;  %s798_s11 = scalar_lea.vmem %s1168_s22, 512  ;;  %p1289_p1 = scmp.ne.s32.totalorder %s1281_s13, 0 }
  0x5f   : > { %v389_v20 = vsub.s32 %v386_v16, %v373_v15  ;;  %v394_v22 = vsub.s32 %v391_v17, %v373_v15  ;;  %v379_v24 = vsub.s32 %v376_v18, %v373_v15  ;;  %p799_p13 = scmp.ne.s32.totalorder %s1168_s22, %s798_s11  ;;  %s907_s17 = smov [#allocation7]  }
  0x60   : > { %366 = vadd.xlane.f32.xlu1 %v365_v10  ;;  %s802_s18 = sshll.u32 %s907_s17, 4  ;;  %s803_s18 = int_to_ptr.vmem [resolvable:$false] %s802_s18 }
  0x61   : > { %360 = vadd.xlane.f32.xlu0 %v359_v11  ;;  %p800_p12 = pnand %p799_p13, %p1289_p1  ;;  %s804_s20 = scalar_lea.vmem %s803_s18, 1024 }
  0x62   : > { %p805_p5 = scmp.lt.s32.totalorder %s1168_s22, %s803_s18  ;;  %p806_p7 = scmp.lt.s32.totalorder %s804_s20, %s798_s11 }
  0x63   : > { %p801_p10 = pneg %p800_p12 }
  0x64   : > { %p807_p9 = por %p806_p7, %p805_p5 }
  0x66   : > { %p808_p11 = pnand %p807_p9, %p801_p10 }
  0x71   : > { %421 = vbcast.lane.b32.xlu1 %v658_v12, 256 }
  0xe9   : > { %v364_v19 = vpop.xlane.xlu1 %363 }
  0xea   : > { %v358_v21 = vpop.xlane.xlu0 %357  ;;  %v390_v26 = vrot.slane %v364_v19, %v389_v20 }
  0xeb   : > { %v375_v29 = vrot.slane %v358_v21, %v374_v23 }
  0xed   : > { %v367_v25 = vpop.xlane.xlu1 %366 }
  0xee   : > { %v395_v27 = vrot.slane %v367_v25, %v394_v22  ;;  %v361_v28 = vpop.xlane.xlu0 %360 }
  0xef   : > { %v380_v30 = vrot.slane %v361_v28, %v379_v24 }
  0xf0   : > { %v397_v31 = vsel %vm396_vm0, %v395_v27, %v390_v26 }
  0xf1   : > { %v382_v32 = vsel %vm381_vm1, %v380_v30, %v375_v29  ;;  %v422_v41 = vpop.permute.xlu1 %421 }
  0xf2   : > { %v400_v34 = vsel %vm399_vm2, %v382_v32, %v397_v31 }
  0xf3   : > { %v401_v35 = vmul.f32 0.00390625, %v400_v34 }
  0xf5   : > { %v409_v37 = vrot.slane %v401_v35, %v408_v33 }
  0xf7   : > { %v410_v38 = vmul.f32 %v409_v37, %v402_v36 }
  0xf9   : > { %v412_v39 = vsel %vm411_vm3, %v410_v38, 0.0 }
  0xfa   : > { %413 = vadd.xlane.f32.xlu0 %v412_v39 }
 0x187   : > { %v414_v42 = vpop.xlane.xlu0 %413 }
 0x188   : > { %v424_v43 = vadd.f32 %v422_v41, %v414_v42 }
 0x18a   : > { %v425_v44 = vmax.f32 %v424_v43, 0.0 }
 0x18c   : > { %428 = vperm.xlu0 %733, %v425_v44  }
 0x20b   : > { %v429_v46 = vpop.permute.xlu0 %428 }
 0x20c   : > { %v431_v47 = vmul.f32 %v429_v46, %v404_v45 }
 0x20e   : > { %v432_v48 = vsel %vm411_vm3, %v431_v47, 0.0 }
 0x20f   : > { %v433_v49 = vrot.slane %v432_v48, 4 }
 0x211   : > { %v434_v50 = vadd.f32 %v433_v49, %v432_v48 }
 0x213   : > { %v435_v51 = vrot.slane %v434_v50, 2 }
 0x215   : > { %v436_v52 = vadd.f32 %v435_v51, %v434_v50 }
 0x217   : > { %v437_v53 = vrot.slane %v436_v52, 1 }
 0x219   : > { %v438_v55 = vadd.f32 %v437_v53, %v436_v52 }
 0x21b   : > { %v439_v56 = vadd.f32 %v438_v55, %v405_v54 }
 0x21d   : > { %v659_v57 = vmul.f32 -1.442695, %v439_v56 }
 0x21f   : > { %734 = vpow2.f32 %v659_v57 }
 0x229   : > { %v735_v58 = vpop.eup %734 }
 0x22a   : > { %v443_v59 = vadd.f32 1.0, %v735_v58 }
 0x22c   : > { %736 = vrcp.f32 %v443_v59 }
 0x236   : > { %v737_v60 = vpop.eup %736 }
 0x237   : > { %v449_v61 = vrot.slane %v737_v60, %v408_v33 }
 0x239   : > { %451 = vbcast.lane.b32.xlu1 %v449_v61, 256 }
 0x23d   : > { %455 = vbcast.lane.b32.xlu1 %v449_v61, 264 }
 0x241   : > { %459 = vbcast.lane.b32.xlu1 %v449_v61, 272 }
 0x245   : > { %463 = vbcast.lane.b32.xlu1 %v449_v61, 280 }
 0x2ab   : > { %v452_v62 = vpop.permute.xlu1 %451 }
 0x2ac   : > { %v465_v63 = vmul.f32 %v452_v62, %v1132_v2  ;;  %v466_v3 = vmul.f32 %v452_v62, %v1136_v4 }
 0x2ae   : > { %469 = vst [vmem:[%s340_s8] sm:$0xff] %v465_v63  ;;  %470 = vst [vmem:[%s340_s8 + $0x8] sm:$0xff] %v466_v3 }
 0x2af   : > { %v456_v7 = vpop.permute.xlu1 %455 }
 0x2b0   : > { %v467_v2 = vmul.f32 %v456_v7, %v1144_v8  ;;  %v468_v10 = vmul.f32 %v456_v7, %v1146_v9 }
 0x2b2   : > { %471 = vst [vmem:[%s340_s8 + $0x10] sm:$0xff] %v467_v2  ;;  %472 = vst [vmem:[%s340_s8 + $0x18] sm:$0xff] %v468_v10 }
 0x2b3   : > { %v460_v4 = vpop.permute.xlu1 %459 }
 0x2b4   : > { %811 = shalt.err (!%p808_p11)
}
 0x2b5   : > { %s812_s0 = scalar_lea.hbm %s1175_s15, 512  ;;  %s816_s8 = scalar_lea.hbm %s1271_s6, 1024 }
 0x2b6   : > { %p813_p3 = scmp.ne.s32.totalorder %s1175_s15, %s812_s0  ;;  %p817_p2 = scmp.lt.u32.totalorder %s1175_s15, %s1271_s6 }
 0x2b7   : > { %p818_p4 = scmp.lt.u32.totalorder %s816_s8, %s812_s0  ;;  %p820_p13 = scmp.lt.u32.totalorder %s812_s0, %s1175_s15 }
 0x2b8   : > { %p814_p8 = pnand %p813_p3, %p1289_p1 }
 0x2b9   : > { %p819_p6 = por %p818_p4, %p817_p2 }
 0x2ba   : > { %p815_p0 = pneg %p814_p8 }
 0x2bb   : > { %p821_p12 = por %p820_p13, %p819_p6 }
 0x2bd   : > { %p822_p10 = pnand %p821_p12, %p815_p0 }
 0x2bf   : > { %825 = shalt.err (!%p822_p10)
}
 0x2c0   : > { %s908_s11 = smov 256   ;;  %s909_s17 = smov 16   ;;  %v473_v8 = vmul.f32 %v460_v4, %v1128_v0  ;;  %v474_v9 = vmul.f32 %v460_v4, %v1130_v1  ;;  %v464_v11 = vpop.permute.xlu1 %463 }
 0x2c1   : > { %676 = dma.vmem_to_hbm [thread:$0]  (%p1289_p1), %s1168_s22, 512, %s1175_s15, %s482_s12, %s908_s11, %s908_s11, %s909_s17   ;;  %v475_v12 = vmul.f32 %v464_v11, %v1138_v5  ;;  %v476_v13 = vmul.f32 %v464_v11, %v1140_v6 }
 0x2c2   : > { %s347_s18 = scalar_lea.vmem [#allocation8], %s1114_s16  ;;  %s1218_s15 = scalar_lea.hbm %s1272_s7, %s670_s23 }
 0x2c3   : > { %s516_s20 = sshll.u32 %s347_s18, 4  ;;  %477 = vst [vmem:[%s347_s18] sm:$0xff] %v473_v8  ;;  %478 = vst [vmem:[%s347_s18 + $0x8] sm:$0xff] %v474_v9  ;;  %s487_s12 = scalar_lea.sflag [#allocation9], %s1111_s21  ;;  %s1209_s20 = int_to_ptr.vmem [resolvable:$true] %s516_s20 }
 0x2c4   : > { %479 = vst [vmem:[%s347_s18 + $0x10] sm:$0xff] %v475_v12  ;;  %480 = vst [vmem:[%s347_s18 + $0x18] sm:$0xff] %v476_v13  ;;  %s826_s0 = scalar_lea.vmem %s1209_s20, 512  ;;  %s910_s19 = smov [#allocation8]  }
 0x2c5   : > { %p827_p5 = scmp.ne.s32.totalorder %s1209_s20, %s826_s0  ;;  %s830_s29 = sshll.u32 %s910_s19, 4  ;;  %s831_s29 = int_to_ptr.vmem [resolvable:$false] %s830_s29 }
 0x2c6   : > { %s832_s8 = scalar_lea.vmem %s831_s29, 1024  ;;  %p833_p11 = scmp.lt.s32.totalorder %s1209_s20, %s831_s29 }
 0x2c7   : > { %p828_p7 = pnand %p827_p5, %p1289_p1  ;;  %p834_p3 = scmp.lt.s32.totalorder %s832_s8, %s826_s0 }
 0x2c9   : > { %p829_p9 = pneg %p828_p7  ;;  %p835_p8 = por %p834_p3, %p833_p11 }
 0x2cb   : > { %p836_p0 = pnand %p835_p8, %p829_p9 }
 0x2cd   : > { %839 = shalt.err (!%p836_p0)
}
 0x2ce   : > { %s840_s28 = scalar_lea.hbm %s1218_s15, 512  ;;  %s844_s10 = scalar_lea.hbm %s1272_s7, 1024 }
 0x2cf   : > { %p841_p2 = scmp.ne.s32.totalorder %s1218_s15, %s840_s28  ;;  %p845_p13 = scmp.lt.u32.totalorder %s1218_s15, %s1272_s7 }
 0x2d0   : > { %p846_p12 = scmp.lt.u32.totalorder %s844_s10, %s840_s28  ;;  %p848_p5 = scmp.lt.u32.totalorder %s840_s28, %s1218_s15 }
 0x2d1   : > { %p842_p4 = pnand %p841_p2, %p1289_p1 }
 0x2d2   : > { %p847_p10 = por %p846_p12, %p845_p13 }
 0x2d3   : > { %p843_p6 = pneg %p842_p4 }
 0x2d4   : > { %p849_p7 = por %p848_p5, %p847_p10 }
 0x2d6   : > { %p850_p9 = pnand %p849_p7, %p843_p6 }
 0x2d8   : > { %853 = shalt.err (!%p850_p9)
}
 0x2d9   : > { %677 = dma.vmem_to_hbm [thread:$0]  (%p1289_p1), %s1209_s20, 512, %s1218_s15, %s487_s12, %s908_s11, %s908_s11, %s909_s17  }
 0x2da PF: > { %s531_s22 = sand.u32 1, %s888_s24   ;;  %p1290_p11 = scmp.ne.s32.totalorder %s1282_s14, 0 }
 0x2db   : > { %p1291_p3 = scmp.ge.s32.totalorder %s900_s27, 2  ;;  %s532_s0 = scalar_lea.sflag [#allocation4], %s531_s22 }
 0x2dd   : > { %p688_p8 = pnand %p1291_p3, %p1290_p11 }
 0x2df   : > { %879 = dma.done.wait (!%p688_p8), %s532_s0, 512  }
 0x2e0   : > { %881 = vsyncadd (!%p688_p8), %s532_s0, 4294966784  ;;  %s541_s13 = scalar_lea.sflag [#allocation9], %s531_s22 }
 0x2e1   : > { %883 = dma.done.wait (!%p688_p8), %s541_s13, 512  }
 0x2e2   : > { %885 = vsyncadd (!%p688_p8), %s541_s13, 4294966784  ;;  %s1292_s21 = sld [smem:[#allocation14_spill]]  ;;  %p27_p1 = scmp.ge.s32.totalorder %s976_s30, 4  }
 0x2e3   : > { %s1293_s24 = smov %s892_s25  ;;  %s1294_s25 = smov %s896_s26 }
 0x2e4   : > { %s1296_s27 = smov %s976_s30  ;;  %29 = sbr.rel (!%p27_p1) target bundleno = 11 (0xb), region = 119 }
 0x2e8   : > { %s1295_s26 = smov %s1292_s21 }
 0x2eb   :  { %546 = vsyncpa [#allocation3], 1 }
 0x2ec   :  { %548 = vsyncpa [#allocation3 + $0x1], 1 }
 0x2ed   :  { %549 = vsyncpa [#allocation6], 1 }
 0x2ee   :  { %551 = vsyncpa [#allocation6 + $0x1], 1 }
 0x2ef   :  { %552 = vsyncpa [#allocation4], 1 }
 0x2f0   :  { %554 = vsyncpa [#allocation4 + $0x1], 1 }
 0x2f1   :  { %555 = vsyncpa [#allocation9], 1 }
 0x2f2   :  { %557 = vsyncpa [#allocation9 + $0x1], 1 }

</bundles_post_ra>
